<compile_context>
chip_gen: v7x
topology: tpu7x:2x2x1
jax: 0.10.0
libtpu: 0.0.40
codegen_flags: <defaults>
</compile_context>

<pallas_src>
import jax
import jax.numpy as jnp
from jax.experimental import pallas as pl
from jax.experimental.pallas import tpu as pltpu

_INV_SQRT2 = 0.7071067811865476
_LN_EPS = 1e-5


def _round_up(x, m):
    return ((x + m - 1) // m) * m


def _dense_gelu_layernorm(x, w1, b1, gamma, beta):
    """f32: dense + bias -> exact erf GELU -> LayerNorm(eps=1e-5)*gamma+beta."""
    h = jnp.dot(x, w1, preferred_element_type=jnp.float32)
    h = h + b1.astype(jnp.float32)
    h = 0.5 * h * (1.0 + jax.lax.erf(h * jnp.float32(_INV_SQRT2)))
    mean = jnp.mean(h, axis=-1, keepdims=True)
    var = jnp.mean(jnp.square(h - mean), axis=-1, keepdims=True)
    hn = (h - mean) * jax.lax.rsqrt(var + jnp.float32(_LN_EPS))
    return hn * gamma.astype(jnp.float32) + beta.astype(jnp.float32)


def _mlm_kernel_rows_outer(x_ref, w1_ref, b1_ref, g_ref, beta_ref, wv_ref,
                           bv_ref, o_ref, hn_ref):
    """grid = (row tiles, vocab tiles); hn cached per row tile."""
    @pl.when(pl.program_id(1) == 0)
    def _prologue():
        hn = _dense_gelu_layernorm(x_ref[...], w1_ref[...], b1_ref[...],
                                   g_ref[...], beta_ref[...])
        hn_ref[...] = hn.astype(hn_ref.dtype)

    scores = jnp.dot(hn_ref[...], wv_ref[...],
                     preferred_element_type=jnp.float32)
    o_ref[...] = (scores + bv_ref[...].astype(jnp.float32)).astype(o_ref.dtype)


def _mlm_kernel_vocab_outer(x_ref, w1_ref, b1_ref, g_ref, beta_ref, wv_ref,
                            bv_ref, o_ref, hn_ref):
    """grid = (vocab tiles, row tiles); hn cached for ALL rows so each
    classifier-weight tile is streamed from HBM exactly once."""
    tm = x_ref.shape[0]
    row0 = pl.multiple_of(pl.program_id(1) * tm, tm)

    @pl.when(pl.program_id(0) == 0)
    def _prologue():
        hn = _dense_gelu_layernorm(x_ref[...], w1_ref[...], b1_ref[...],
                                   g_ref[...], beta_ref[...])
        hn_ref[pl.ds(row0, tm), :] = hn.astype(hn_ref.dtype)

    scores = jnp.dot(hn_ref[pl.ds(row0, tm), :], wv_ref[...],
                     preferred_element_type=jnp.float32)
    o_ref[...] = (scores + bv_ref[...].astype(jnp.float32)).astype(o_ref.dtype)


def prepare_mlm_head_params(w_dense, b_dense, ln_gamma, ln_beta, emb_weight,
                            b_mlm, *, compute_dtype=jnp.bfloat16, tv_max=2048):
    """One-time weight preparation (do NOT call per forward step).

    w_dense:    [E, D]  nn.Linear weight (PyTorch [out, in] layout)
    emb_weight: [V, E]  tied word-embedding weight

    Transposes to [in, out] layout, casts MXU operands to `compute_dtype`,
    and pads the vocab axis once so the per-call path does no padding work.
    Biases / LN affine params stay f32 (applied on the f32 accumulator).
    """
    E, D = w_dense.shape
    V = emb_weight.shape[0]
    tv = min(int(tv_max), _round_up(V, 128))
    Vp = _round_up(_round_up(V, 128), tv)

    wv = jnp.asarray(emb_weight).T.astype(compute_dtype)       # [E, V]
    bv = jnp.asarray(b_mlm, jnp.float32).reshape(1, V)
    if Vp != V:
        wv = jnp.pad(wv, ((0, 0), (0, Vp - V)))
        bv = jnp.pad(bv, ((0, 0), (0, Vp - V)))

    # TODO(synk): if E is neither a multiple of 128 nor the full block dim
    # (e.g. odd non-BERT configs), pad E here and mask the LayerNorm reduction.
    return dict(
        w1=jnp.asarray(w_dense).T.astype(compute_dtype),       # [D, E]
        b1=jnp.asarray(b_dense, jnp.float32).reshape(1, E),
        gamma=jnp.asarray(ln_gamma, jnp.float32).reshape(1, E),
        beta=jnp.asarray(ln_beta, jnp.float32).reshape(1, E),
        wv=wv,                                                  # [E, Vp]
        bv=bv,                                                  # [1, Vp]
        vocab_size=V, vocab_padded=Vp, tv=tv,
    )


def mlm_head_forward(x, params, *, tm_max=512, out_dtype=jnp.bfloat16,
                     hn_cache_bytes_max=16 << 20, vmem_limit_bytes=None):
    """x: [B, S, D] activations; params from prepare_mlm_head_params.

    Returns [B, S, V] logits in `out_dtype` (default bf16; accumulation f32).
    Call under jax.jit so the reshape/cast/pad of x fuses with the kernel.
    """
    B, S, D = x.shape
    w1, b1 = params["w1"], params["b1"]
    gamma, beta = params["gamma"], params["beta"]
    wv, bv = params["wv"], params["bv"]
    V, Vp, tv = params["vocab_size"], params["vocab_padded"], params["tv"]
    compute_dtype = w1.dtype
    E = w1.shape[1]

    M = B * S
    x2 = x.reshape(M, D).astype(compute_dtype)

    # Row tiling: tm multiple of 8 (a multiple of 128 for real configs).
    Mp = _round_up(M, 8)
    tm = min(int(tm_max), Mp)
    Mp = _round_up(Mp, tm)
    if Mp != M:
        x2 = jnp.pad(x2, ((0, Mp - M), (0, 0)))

    n_row = Mp // tm
    n_voc = Vp // tv

    cd = jnp.dtype(compute_dtype).itemsize
    od = jnp.dtype(out_dtype).itemsize

    # Full-M hn cache fits VMEM -> stream the classifier weight exactly once.
    vocab_outer = Mp * E * cd <= hn_cache_bytes_max

    if vocab_outer:
        grid = (n_voc, n_row)
        kernel = _mlm_kernel_vocab_outer
        in_specs = [
            pl.BlockSpec((tm, D), lambda j, i: (i, 0)),    # x row tile
            pl.BlockSpec((D, E), lambda j, i: (0, 0)),     # dense weight (resident)
            pl.BlockSpec((1, E), lambda j, i: (0, 0)),     # dense bias
            pl.BlockSpec((1, E), lambda j, i: (0, 0)),     # LN gamma
            pl.BlockSpec((1, E), lambda j, i: (0, 0)),     # LN beta
            pl.BlockSpec((E, tv), lambda j, i: (0, j)),    # classifier weight tile
            pl.BlockSpec((1, tv), lambda j, i: (0, j)),    # classifier bias tile
        ]
        out_specs = pl.BlockSpec((tm, tv), lambda j, i: (i, j))
        scratch = [pltpu.VMEM((Mp, E), compute_dtype)]     # hn for ALL rows
        # hn scratch written at outer==0 is reused across the outer axis and
        # row tiles are interleaved under it -> both axes "arbitrary".
        dim_sem = ("arbitrary", "arbitrary")
        bytes_accessed = (n_voc * Mp * D * cd + D * E * cd + 3 * E * 4
                          + E * Vp * cd + Vp * 4 + Mp * Vp * od)
        scratch_bytes = Mp * E * cd
    else:
        grid = (n_row, n_voc)
        kernel = _mlm_kernel_rows_outer
        in_specs = [
            pl.BlockSpec((tm, D), lambda i, j: (i, 0)),
            pl.BlockSpec((D, E), lambda i, j: (0, 0)),
            pl.BlockSpec((1, E), lambda i, j: (0, 0)),
            pl.BlockSpec((1, E), lambda i, j: (0, 0)),
            pl.BlockSpec((1, E), lambda i, j: (0, 0)),
            pl.BlockSpec((E, tv), lambda i, j: (0, j)),
            pl.BlockSpec((1, tv), lambda i, j: (0, j)),
        ]
        out_specs = pl.BlockSpec((tm, tv), lambda i, j: (i, j))
        scratch = [pltpu.VMEM((tm, E), compute_dtype)]     # hn per row tile
        dim_sem = ("parallel", "arbitrary")
        bytes_accessed = (Mp * D * cd + D * E * cd + 3 * E * 4
                          + n_row * (E * Vp * cd + Vp * 4) + Mp * Vp * od)
        scratch_bytes = tm * E * cd

    if vmem_limit_bytes is None:
        block_bytes = ((tm * D + D * E + E * tv) * cd
                       + (3 * E + tv) * 4 + tm * tv * od)
        vmem_limit_bytes = min(max(2 * block_bytes + scratch_bytes + (16 << 20),
                                   32 << 20),
                               96 << 20)

    cost = pl.CostEstimate(
        flops=2 * Mp * D * E + 2 * Mp * E * Vp,
        transcendentals=Mp * E,
        bytes_accessed=int(bytes_accessed),
    )

    out = pl.pallas_call(
        kernel,
        out_shape=jax.ShapeDtypeStruct((Mp, Vp), out_dtype),
        grid=grid,
        in_specs=in_specs,
        out_specs=out_specs,
        scratch_shapes=scratch,
        compiler_params=pltpu.CompilerParams(
            dimension_semantics=dim_sem,
            vmem_limit_bytes=int(vmem_limit_bytes),
        ),
        cost_estimate=cost,
    )(x2, w1, b1, gamma, beta, wv, bv)

    return out[:M, :V].reshape(B, S, V)


def _reference(x, w_dense, b_dense, ln_gamma, ln_beta, emb_weight, b_mlm,
               compute_dtype=jnp.bfloat16, out_dtype=jnp.bfloat16):
    """Mixed-precision reference mirroring the kernel's math."""
    B, S, D = x.shape
    xb = x.reshape(B * S, D).astype(compute_dtype)
    h = jnp.dot(xb, jnp.asarray(w_dense).T.astype(compute_dtype),
                preferred_element_type=jnp.float32)
    h = h + b_dense.astype(jnp.float32)
    h = 0.5 * h * (1.0 + jax.lax.erf(h * _INV_SQRT2))
    mean = jnp.mean(h, axis=-1, keepdims=True)
    var = jnp.mean(jnp.square(h - mean), axis=-1, keepdims=True)
    hn = (h - mean) * jax.lax.rsqrt(var + _LN_EPS)
    hn = hn * ln_gamma + ln_beta
    s = jnp.dot(hn.astype(compute_dtype),
                jnp.asarray(emb_weight).T.astype(compute_dtype),
                preferred_element_type=jnp.float32)
    s = s + b_mlm
    return s.reshape(B, S, -1).astype(out_dtype)


if __name__ == "__main__":
    # Toy config: dim=32, embedding_dim=32, vocab_size=128, batch=2, seq=8.
    B, S, D, E, V = 2, 8, 32, 32, 128

    key = jax.random.PRNGKey(0)
    k_x, k_w1, k_b1, k_g, k_bt, k_emb, k_bv = jax.random.split(key, 7)

    x = jax.random.normal(k_x, (B, S, D), dtype=jnp.float32)
    w_dense = jax.random.normal(k_w1, (E, D), dtype=jnp.float32) * 0.05    # [out, in]
    b_dense = jax.random.normal(k_b1, (E,), dtype=jnp.float32) * 0.05
    ln_gamma = 1.0 + 0.05 * jax.random.normal(k_g, (E,), dtype=jnp.float32)
    ln_beta = 0.05 * jax.random.normal(k_bt, (E,), dtype=jnp.float32)
    emb_weight = jax.random.normal(k_emb, (V, E), dtype=jnp.float32) * 0.05  # [vocab, emb]
    b_mlm = jax.random.normal(k_bv, (V,), dtype=jnp.float32) * 0.05

    params = prepare_mlm_head_params(w_dense, b_dense, ln_gamma, ln_beta,
                                     emb_weight, b_mlm)

    # Path A: vocab-outer with full-M hn cache (default for this toy size).
    fwd_a = jax.jit(lambda xx: mlm_head_forward(xx, params))
    scores_a = jax.block_until_ready(fwd_a(x))

    # Path B: rows-outer fallback (forced), to check both structures compile.
    fwd_b = jax.jit(lambda xx: mlm_head_forward(xx, params,
                                                hn_cache_bytes_max=0))
    scores_b = jax.block_until_ready(fwd_b(x))

    ref = _reference(x, w_dense, b_dense, ln_gamma, ln_beta, emb_weight, b_mlm)

    assert scores_a.shape == (B, S, V)
    assert scores_b.shape == (B, S, V)
    for scores in (scores_a, scores_b):
        err = jnp.max(jnp.abs(scores.astype(jnp.float32) - ref.astype(jnp.float32)))
        assert jnp.allclose(scores.astype(jnp.float32), ref.astype(jnp.float32),
                            atol=3e-2, rtol=3e-2), float(err)

    print("KERNEL_OK")
</pallas_src>

<mosaic_0001>
module attributes {stable_mosaic.version = 11 : i64} {
  func.func @_mlm_kernel_vocab_outer(%arg0: i32, %arg1: i32, %arg2: memref<16x32xbf16, #tpu.memory_space<vmem>>, %arg3: memref<32x32xbf16, #tpu.memory_space<vmem>>, %arg4: memref<1x32xf32, #tpu.memory_space<vmem>>, %arg5: memref<1x32xf32, #tpu.memory_space<vmem>>, %arg6: memref<1x32xf32, #tpu.memory_space<vmem>>, %arg7: memref<32x128xbf16, #tpu.memory_space<vmem>>, %arg8: memref<1x128xf32, #tpu.memory_space<vmem>>, %arg9: memref<16x128xbf16, #tpu.memory_space<vmem>>, %arg10: memref<16x32xbf16, #tpu.memory_space<vmem>>) attributes {dimension_semantics = [#tpu.dimension_semantics<arbitrary>, #tpu.dimension_semantics<arbitrary>], iteration_bounds = array<i64: 1, 1>, scalar_prefetch = 0 : i64, scratch_operands = 1 : i64, tpu.core_type = #tpu.core_type<tc>, window_params = [{transform_indices = @transform_0, window_bounds = array<i64: 16, 32>}, {pipeline_mode = #tpu.pipeline_mode<synchronous>, transform_indices = @transform_1, window_bounds = array<i64: 32, 32>}, {pipeline_mode = #tpu.pipeline_mode<synchronous>, transform_indices = @transform_2, window_bounds = array<i64: 1, 32>}, {pipeline_mode = #tpu.pipeline_mode<synchronous>, transform_indices = @transform_3, window_bounds = array<i64: 1, 32>}, {pipeline_mode = #tpu.pipeline_mode<synchronous>, transform_indices = @transform_4, window_bounds = array<i64: 1, 32>}, {transform_indices = @transform_5, window_bounds = array<i64: 32, 128>}, {transform_indices = @transform_6, window_bounds = array<i64: 1, 128>}, {transform_indices = @transform_7, window_bounds = array<i64: 16, 128>}]} {
    %c16_i32 = arith.constant 16 : i32
    %0 = arith.muli %arg1, %c16_i32 : i32
    %1 = tpu.assume_multiple %0, 16 : i32
    %c0_i32 = arith.constant 0 : i32
    %2 = arith.cmpi eq, %arg0, %c0_i32 : i32
    %3 = arith.extui %2 : i1 to i32
    %c0_i32_0 = arith.constant 0 : i32
    %4 = arith.cmpi ne, %3, %c0_i32_0 : i32
    scf.if %4 {
      %c0_7 = arith.constant 0 : index
      %c0_8 = arith.constant 0 : index
      %14 = vector.load %arg2[%c0_7, %c0_8] : memref<16x32xbf16, #tpu.memory_space<vmem>>, vector<16x32xbf16>
      %c0_9 = arith.constant 0 : index
      %c0_10 = arith.constant 0 : index
      %15 = vector.load %arg3[%c0_9, %c0_10] : memref<32x32xbf16, #tpu.memory_space<vmem>>, vector<32x32xbf16>
      %c0_11 = arith.constant 0 : index
      %c0_12 = arith.constant 0 : index
      %16 = vector.load %arg4[%c0_11, %c0_12] : memref<1x32xf32, #tpu.memory_space<vmem>>, vector<1x32xf32>
      %c0_13 = arith.constant 0 : index
      %c0_14 = arith.constant 0 : index
      %17 = vector.load %arg5[%c0_13, %c0_14] : memref<1x32xf32, #tpu.memory_space<vmem>>, vector<1x32xf32>
      %c0_15 = arith.constant 0 : index
      %c0_16 = arith.constant 0 : index
      %18 = vector.load %arg6[%c0_15, %c0_16] : memref<1x32xf32, #tpu.memory_space<vmem>>, vector<1x32xf32>
      %cst_17 = arith.constant dense<0.000000e+00> : vector<16x32xf32>
      %19 = tpu.matmul %14, %15, %cst_17 {dimension_numbers = #tpu.dot_dimension_numbers<[1], [0], [0], [1], [0, 0, 1, 1], [], []>} : vector<16x32xbf16>, vector<32x32xbf16>, vector<16x32xf32> -> vector<16x32xf32>
      %20 = vector.broadcast %16 : vector<1x32xf32> to vector<16x32xf32>
      %21 = arith.addf %19, %20 : vector<16x32xf32>
      %cst_18 = arith.constant 5.000000e-01 : f32
      %22 = vector.broadcast %cst_18 : f32 to vector<16x32xf32>
      %23 = arith.mulf %22, %21 : vector<16x32xf32>
      %cst_19 = arith.constant 0.707106769 : f32
      %24 = vector.broadcast %cst_19 : f32 to vector<16x32xf32>
      %25 = arith.mulf %21, %24 : vector<16x32xf32>
      %26 = math.erf %25 : vector<16x32xf32>
      %cst_20 = arith.constant 1.000000e+00 : f32
      %27 = vector.broadcast %cst_20 : f32 to vector<16x32xf32>
      %28 = arith.addf %27, %26 : vector<16x32xf32>
      %29 = arith.mulf %23, %28 : vector<16x32xf32>
      %cst_21 = arith.constant dense<0.000000e+00> : vector<16xf32>
      %30 = vector.multi_reduction <add>, %29, %cst_21 [1] : vector<16x32xf32> to vector<16xf32>
      %31 = vector.shape_cast %30 : vector<16xf32> to vector<16x1xf32>
      %cst_22 = arith.constant 3.200000e+01 : f32
      %32 = vector.broadcast %cst_22 : f32 to vector<16x1xf32>
      %33 = arith.divf %31, %32 : vector<16x1xf32>
      %34 = vector.broadcast %33 : vector<16x1xf32> to vector<16x32xf32>
      %35 = arith.subf %29, %34 : vector<16x32xf32>
      %36 = arith.mulf %35, %35 : vector<16x32xf32>
      %cst_23 = arith.constant dense<0.000000e+00> : vector<16xf32>
      %37 = vector.multi_reduction <add>, %36, %cst_23 [1] : vector<16x32xf32> to vector<16xf32>
      %38 = vector.shape_cast %37 : vector<16xf32> to vector<16x1xf32>
      %cst_24 = arith.constant 3.200000e+01 : f32
      %39 = vector.broadcast %cst_24 : f32 to vector<16x1xf32>
      %40 = arith.divf %38, %39 : vector<16x1xf32>
      %41 = vector.broadcast %33 : vector<16x1xf32> to vector<16x32xf32>
      %42 = arith.subf %29, %41 : vector<16x32xf32>
      %cst_25 = arith.constant 9.99999974E-6 : f32
      %43 = vector.broadcast %cst_25 : f32 to vector<16x1xf32>
      %44 = arith.addf %40, %43 : vector<16x1xf32>
      %45 = math.rsqrt %44 : vector<16x1xf32>
      %46 = vector.broadcast %45 : vector<16x1xf32> to vector<16x32xf32>
      %47 = arith.mulf %42, %46 : vector<16x32xf32>
      %48 = vector.broadcast %17 : vector<1x32xf32> to vector<16x32xf32>
      %49 = arith.mulf %47, %48 : vector<16x32xf32>
      %50 = vector.broadcast %18 : vector<1x32xf32> to vector<16x32xf32>
      %51 = arith.addf %49, %50 : vector<16x32xf32>
      %52 = arith.truncf %51 : vector<16x32xf32> to vector<16x32xbf16>
      %53 = arith.index_cast %1 : i32 to index
      %c0_26 = arith.constant 0 : index
      %54 = vector.load %arg10[%53, %c0_26] : memref<16x32xbf16, #tpu.memory_space<vmem>>, vector<16x32xbf16>
      tpu.vector_store %arg10[%53, %c0_26], %52 {strides = array<i32>} : memref<16x32xbf16, #tpu.memory_space<vmem>>, vector<16x32xbf16>,
    } else {
    }
    %5 = arith.index_cast %1 : i32 to index
    %c0 = arith.constant 0 : index
    %6 = vector.load %arg10[%5, %c0] : memref<16x32xbf16, #tpu.memory_space<vmem>>, vector<16x32xbf16>
    %c0_1 = arith.constant 0 : index
    %c0_2 = arith.constant 0 : index
    %7 = vector.load %arg7[%c0_1, %c0_2] : memref<32x128xbf16, #tpu.memory_space<vmem>>, vector<32x128xbf16>
    %cst = arith.constant dense<0.000000e+00> : vector<16x128xf32>
    %8 = tpu.matmul %6, %7, %cst {dimension_numbers = #tpu.dot_dimension_numbers<[1], [0], [0], [1], [0, 0, 1, 1], [], []>} : vector<16x32xbf16>, vector<32x128xbf16>, vector<16x128xf32> -> vector<16x128xf32>
    %c0_3 = arith.constant 0 : index
    %c0_4 = arith.constant 0 : index
    %9 = vector.load %arg8[%c0_3, %c0_4] : memref<1x128xf32, #tpu.memory_space<vmem>>, vector<1x128xf32>
    %10 = vector.broadcast %9 : vector<1x128xf32> to vector<16x128xf32>
    %11 = arith.addf %8, %10 : vector<16x128xf32>
    %12 = arith.truncf %11 : vector<16x128xf32> to vector<16x128xbf16>
    %c0_5 = arith.constant 0 : index
    %c0_6 = arith.constant 0 : index
    %13 = vector.load %arg9[%c0_5, %c0_6] : memref<16x128xbf16, #tpu.memory_space<vmem>>, vector<16x128xbf16>
    tpu.vector_store %arg9[%c0_5, %c0_6], %12 {strides = array<i32>} : memref<16x128xbf16, #tpu.memory_space<vmem>>, vector<16x128xbf16>,
    return
  }
  func.func @transform_0(%arg0: i32, %arg1: i32) -> (i32, i32) {
    %c0_i32 = arith.constant 0 : i32
    %c0_i32_0 = arith.constant 0 : i32
    return %arg1, %c0_i32 : i32, i32
  }
  func.func @transform_1(%arg0: i32, %arg1: i32) -> (i32, i32) {
    %c0_i32 = arith.constant 0 : i32
    %c0_i32_0 = arith.constant 0 : i32
    %c0_i32_1 = arith.constant 0 : i32
    return %c0_i32, %c0_i32_0 : i32, i32
  }
  func.func @transform_2(%arg0: i32, %arg1: i32) -> (i32, i32) {
    %c0_i32 = arith.constant 0 : i32
    %c0_i32_0 = arith.constant 0 : i32
    %c0_i32_1 = arith.constant 0 : i32
    return %c0_i32, %c0_i32_0 : i32, i32
  }
  func.func @transform_3(%arg0: i32, %arg1: i32) -> (i32, i32) {
    %c0_i32 = arith.constant 0 : i32
    %c0_i32_0 = arith.constant 0 : i32
    %c0_i32_1 = arith.constant 0 : i32
    return %c0_i32, %c0_i32_0 : i32, i32
  }
  func.func @transform_4(%arg0: i32, %arg1: i32) -> (i32, i32) {
    %c0_i32 = arith.constant 0 : i32
    %c0_i32_0 = arith.constant 0 : i32
    %c0_i32_1 = arith.constant 0 : i32
    return %c0_i32, %c0_i32_0 : i32, i32
  }
  func.func @transform_5(%arg0: i32, %arg1: i32) -> (i32, i32) {
    %c0_i32 = arith.constant 0 : i32
    %c0_i32_0 = arith.constant 0 : i32
    return %c0_i32, %arg0 : i32, i32
  }
  func.func @transform_6(%arg0: i32, %arg1: i32) -> (i32, i32) {
    %c0_i32 = arith.constant 0 : i32
    %c0_i32_0 = arith.constant 0 : i32
    return %c0_i32, %arg0 : i32, i32
  }
  func.func @transform_7(%arg0: i32, %arg1: i32) -> (i32, i32) {
    %c0_i32 = arith.constant 0 : i32
    return %arg1, %arg0 : i32, i32
  }
}

</mosaic_0001>

<bundles_post_ra>
// kernel: _lambda_.1
= control target key start
LH: loop header
LB: loop body
LE: loop exit
PB: predicated region body
PF: predicated region fallthrough
CT: control target
= control target key end

     0   :  { %12 = vsyncpa [#allocation4], 0  ;;  %s495_s0 = inlined_call_operand.vmem [shape: bf16[16,32], index: 0, kind: input, shape index: {}]   ;;  %s496_s1 = inlined_call_operand.vmem [shape: bf16[32,32], index: 1, kind: input, shape index: {}]   ;;  %s497_s2 = inlined_call_operand.hbm [shape: f32[1,32], index: 2, kind: input, shape index: {}]   ;;  %s498_s3 = inlined_call_operand.vmem [shape: f32[1,32], index: 3, kind: input, shape index: {}]   ;;  %s499_s4 = inlined_call_operand.vmem [shape: f32[1,32], index: 4, kind: input, shape index: {}]   ;;  %s500_s5 = inlined_call_operand.vmem [shape: bf16[32,128], index: 5, kind: input, shape index: {}]   ;;  %s501_s6 = inlined_call_operand.vmem [shape: f32[1,128], index: 6, kind: input, shape index: {}]   ;;  %s502_s7 = inlined_call_operand.hbm [shape: bf16[16,128], index: 7, kind: output, shape index: {}]  }
   0x1   :  { %13 = vsyncpa [#allocation5], 0  ;;  %s394_s24 = smov [#allocation3]   ;;  %s346_s28 = scalar_lea.hbm %s497_s2, 16 }
   0x2   :  { %s24_s25 = sshll.u32 %s394_s24, 4  ;;  %p347_p0 = scmp.ne.s32.totalorder %s497_s2, %s346_s28  ;;  %s25_s25 = int_to_ptr.vmem [resolvable:$true] %s24_s25 }
   0x3   :  { %p350_p1 = scmp.lt.u32.totalorder %s346_s28, %s497_s2 }
   0x5   :  { %p352_p2 = pnand %p350_p1, %p347_p0 }
   0x7   :  { %355 = shalt.err (!%p352_p2)
}
   0x8   :  { %s356_s10 = scalar_lea.vmem %s25_s25, 16  ;;  %s360_s11 = scalar_lea.vmem %s25_s25, 32 }
   0x9   :  { %p357_p3 = scmp.ne.s32.totalorder %s25_s25, %s356_s10  ;;  %p361_p4 = scmp.lt.s32.totalorder %s25_s25, %s25_s25 }
   0xa   :  { %p362_p5 = scmp.lt.s32.totalorder %s360_s11, %s356_s10 }
   0xc   :  { %p363_p6 = por %p362_p5, %p361_p4 }
   0xe   :  { %p364_p7 = pnand %p363_p6, %p357_p3 }
  0x10   :  { %367 = shalt.err (!%p364_p7)
}
  0x11   :  { %27 = dma.hbm_to_vmem [thread:$0]  %s497_s2, 16, %s25_s25, [#allocation4]  }
  0x12   :  { %390 = dma.done.wait [#allocation4], 16  }
  0x13   :  { %391 = vsyncadd [#allocation4], 4294967280  ;;  %v395_v0 = vmov 0.0   ;;  %vm396_vm0 = vmmov 0   ;;  %v333_v1 = vld [vmem:[%s496_s1] sm:$0xff]   ;;  %v334_v2 = vld [vmem:[%s496_s1 + $0x8] sm:$0xff]  }
  0x14   :  { %311 = vmatprep.subr.bf16.mxu0 %v395_v0  ;;  %315 = vmatprep.mubr.msk.bf16.mxu0 %vm396_vm0, %v395_v0  ;;  %v335_v3 = vld [vmem:[%s495_s0] sm:$0xff]   ;;  %vm77_vm1 = vcmask 261120   ;;  %v285_v4 = vld [vmem:[#allocation3] ss:$0 sm:$0xff] }
  0x15   :  { %319 = vmatprep.subr.bf16.mxu1 %v395_v0  ;;  %323 = vmatprep.mubr.msk.bf16.mxu1 %vm396_vm0, %v395_v0  ;;  %v336_v33 = vld [vmem:[%s500_s5] sm:$0xff]   ;;  %v337_v34 = vld [vmem:[%s500_s5 + $0x8] sm:$0xff]  }
  0x16   :  { %312 = vmatpush3.bf16.msra.mxu0 %v333_v1  ;;  %320 = vmatpush3.bf16.msra.mxu1 %v336_v33  ;;  %v290_v43 = vld [vmem:[%s498_s3] ss:$0 sm:$0xff]  ;;  %s397_s3 = smov [#allocation6]  }
  0x17   :  { %313 = vmatprep.subr.bf16.mxu0 %v395_v0  ;;  %321 = vmatprep.subr.bf16.mxu1 %v395_v0  ;;  %v291_v47 = vld [vmem:[%s499_s4] ss:$0 sm:$0xff]  ;;  %s269_s26 = sshll.u32 %s397_s3, 4  ;;  %s270_s26 = int_to_ptr.vmem [resolvable:$true] %s269_s26 }
  0x18   :  { %v292_v53 = vld [vmem:[%s501_s6] ss:$0 sm:$0xff]  ;;  %s368_s4 = scalar_lea.vmem %s270_s26, 128  ;;  %p373_p9 = scmp.lt.s32.totalorder %s270_s26, %s270_s26 }
  0x19   :  { %p369_p8 = scmp.ne.s32.totalorder %s270_s26, %s368_s4  ;;  %p374_p10 = scmp.lt.s32.totalorder %s368_s4, %s368_s4 }
  0x1a   :  { %314 = vmatpush3.bf16.msra.mxu0 %v334_v2  ;;  %322 = vmatpush3.bf16.msra.mxu1 %v337_v34 }
  0x1b   :  { %p375_p11 = por %p374_p10, %p373_p9 }
  0x1d   :  { %316 = vmatmul.mubr.msk.bf16.vlgmr.msra.gmra.mrb[0].mxu0 %vm77_vm1, %v335_v3  ;;  %p376_p12 = pnand %p375_p11, %p369_p8 }
  0xf0   :  { %v115_v5 = vpop.f32.mrb[0].mxu0 }
  0xf1   :  { %v116_v6 = vadd.f32 %v285_v4, %v115_v5  ;;  %v317_v7 = vpop.f32.mrb[1].mxu0 }
  0xf2   :  { %v118_v8 = vpop.f32.mrb[2].mxu0 }
  0xf3   :  { %v124_v9 = vmul.f32 0.70710677, %v116_v6  ;;  %v119_v10 = vadd.f32 %v285_v4, %v118_v8  ;;  %v318_v11 = vpop.f32.mrb[3].mxu0  ;;  %v122_v14 = vmul.f32 0.5, %v116_v6 }
  0xf5   :  { %338 = verf.f32 %v124_v9  ;;  %v125_v12 = vmul.f32 0.70710677, %v119_v10  ;;  %v123_v17 = vmul.f32 0.5, %v119_v10 }
  0xf7   :  { %340 = verf.f32 %v125_v12 }
  0xff   :  { %v339_v13 = vpop.eup %338 }
 0x100   :  { %v128_v15 = vadd.f32 1.0, %v339_v13 }
 0x101   :  { %v341_v16 = vpop.eup %340 }
 0x102   :  { %v130_v18 = vmul.f32 %v128_v15, %v122_v14  ;;  %v129_v19 = vadd.f32 1.0, %v341_v16 }
 0x104   :  { %v132_v20 = vsel %vm77_vm1, %v130_v18, 0.0  ;;  %v131_v21 = vmul.f32 %v129_v19, %v123_v17 }
 0x105   :  { %133 = vadd.xlane.f32.xlu0 %v132_v20 }
 0x106   :  { %v135_v22 = vsel %vm77_vm1, %v131_v21, 0.0 }
 0x109   :  { %136 = vadd.xlane.f32.xlu0 %v135_v22 }
 0x192   :  { %v134_v23 = vpop.xlane.xlu0 %133 }
 0x193   :  { %v139_v24 = vmul.f32 0.03125, %v134_v23 }
 0x195   :  { %v141_v25 = vsub.f32 %v130_v18, %v139_v24 }
 0x196   :  { %v137_v26 = vpop.xlane.xlu0 %136 }
 0x197   :  { %v140_v27 = vmul.f32 0.03125, %v137_v26  ;;  %v143_v28 = vmul.f32 %v141_v25, %v141_v25 }
 0x199   :  { %v142_v29 = vsub.f32 %v131_v21, %v140_v27  ;;  %v145_v30 = vsel %vm77_vm1, %v143_v28, 0.0 }
 0x19a   :  { %146 = vadd.xlane.f32.xlu1 %v145_v30 }
 0x19b   :  { %v144_v31 = vmul.f32 %v142_v29, %v142_v29 }
 0x19d   :  { %v148_v32 = vsel %vm77_vm1, %v144_v31, 0.0 }
 0x19e   :  { %149 = vadd.xlane.f32.xlu1 %v148_v32 }
 0x227   :  { %v147_v35 = vpop.xlane.xlu1 %146 }
 0x228   :  { %v151_v36 = vmul.f32 0.03125, %v147_v35 }
 0x22a   :  { %v153_v37 = vadd.f32 1e-05, %v151_v36 }
 0x22b   :  { %v150_v38 = vpop.xlane.xlu1 %149 }
 0x22c   :  { %342 = vrsqrt.f32 %v153_v37  ;;  %v152_v39 = vmul.f32 0.03125, %v150_v38 }
 0x22e   :  { %v154_v40 = vadd.f32 1e-05, %v152_v39 }
 0x230   :  { %344 = vrsqrt.f32 %v154_v40 }
 0x236   :  { %v343_v41 = vpop.eup %342 }
 0x237   :  { %v157_v42 = vmul.f32 %v343_v41, %v141_v25 }
 0x239   :  { %v165_v45 = vmul.f32 %v290_v43, %v157_v42 }
 0x23a   :  { %v345_v44 = vpop.eup %344 }
 0x23b   :  { %v158_v46 = vmul.f32 %v345_v44, %v142_v29  ;;  %v173_v49 = vadd.f32 %v291_v47, %v165_v45 }
 0x23d   :  { %v166_v48 = vmul.f32 %v290_v43, %v158_v46 }
 0x23f   :  { %v174_v50 = vadd.f32 %v291_v47, %v166_v48 }
 0x241   :  { %v175_v51 = vpack.c.bf16 %v174_v50, %v173_v49 }
 0x243   :  { %180 = vst.msk [vmem:[#allocation2] sm:$0xff] %vm77_vm1, %v175_v51 }
 0x24a   :  { %v185_v52 = vld [vmem:[#allocation2] sm:$0xff] }
 0x24b   :  { %324 = vmatmul.mubr.msk.bf16.vlgmr.msra.gmra.mrb[0].mxu1 %vm77_vm1, %v185_v52 }
 0x31e   :  { %v247_v54 = vpop.f32.mrb[0].mxu1 }
 0x31f   :  { %v325_v55 = vpop.f32.mrb[1].mxu1  ;;  %v248_v57 = vadd.f32 %v292_v53, %v247_v54 }
 0x320   :  { %v250_v56 = vpop.f32.mrb[2].mxu1 }
 0x321   :  { %v251_v58 = vadd.f32 %v292_v53, %v250_v56  ;;  %v326_v59 = vpop.f32.mrb[3].mxu1 }
 0x323   :  { %v303_v60 = vpack.c.bf16 %v251_v58, %v248_v57 }
 0x325   :  { %304 = vst [vmem:[#allocation6] sm:$0xff] %v303_v60  }
 0x326   :  { %379 = shalt.err (!%p376_p12)
}
 0x327   :  { %s380_s28 = scalar_lea.hbm %s502_s7, 128 }
 0x328   :  { %p381_p13 = scmp.ne.s32.totalorder %s502_s7, %s380_s28  ;;  %p384_p0 = scmp.lt.u32.totalorder %s380_s28, %s502_s7 }
 0x32a   :  { %p386_p1 = pnand %p384_p0, %p381_p13 }
 0x32c   :  { %389 = shalt.err (!%p386_p1)
}
 0x32d   :  { %s398_s10 = smov 64   ;;  %s399_s11 = smov 4  }
 0x32e   :  { %275 = dma.vmem_to_hbm [thread:$0]  %s270_s26, 128, %s502_s7, [#allocation5], %s398_s10, %s398_s10, %s399_s11  }
 0x32f   :  { %392 = dma.done.wait [#allocation5], 128  }
 0x330   :  { %393 = vsyncadd [#allocation5], 4294967168 }
 0x331   :  { %279 = vsyncpa [#allocation4], 1 }
 0x332   :  { %280 = vsyncpa [#allocation5], 1 }

</bundles_post_ra>
